<compile_context>
chip_gen: v7x
topology: tpu7x:2x2x1
jax: 0.10.0
libtpu: 0.0.40
codegen_flags: <defaults>
</compile_context>

<pallas_src>
import functools

import jax
import jax.numpy as jnp
from jax.experimental import pallas as pl
from jax.experimental.pallas import tpu as pltpu

_LANES = 128
_SUBLANES = 8


def _round_up(a: int, b: int) -> int:
    return ((a + b - 1) // b) * b


def _bce_partial_kernel(x_ref, y_ref, out_ref, *,
                        loss_type: str, pos_weight, total: int,
                        block_rows: int, needs_mask: bool):
    """Per-block BCE(-with-logits) loss; writes a (1, 128) per-lane partial sum."""
    x = x_ref[...].astype(jnp.float32)
    y = y_ref[...].astype(jnp.float32)

    if loss_type == "bce_logits":
        # Numerically stable softplus(-x) = log1p(exp(-|x|)) + max(-x, 0)
        sp_neg = jnp.log1p(jnp.exp(-jnp.abs(x))) + jnp.maximum(-x, 0.0)
        if pos_weight is None:
            coef = 1.0
        else:
            coef = 1.0 + (jnp.float32(pos_weight) - 1.0) * y
        # (1-y)*x + coef*softplus(-x)  ==  max(x,0) - x*y + log1p(exp(-|x|))  (pw=None)
        l = (1.0 - y) * x + coef * sp_neg
    elif loss_type == "bce":
        # torch.nn.BCELoss on probabilities, log clamped to >= -100.
        log_x = jnp.maximum(jnp.log(x), -100.0)
        log_1mx = jnp.maximum(jnp.log(1.0 - x), -100.0)
        l = -(y * log_x + (1.0 - y) * log_1mx)
    else:
        raise ValueError(f"unsupported loss_type: {loss_type}")

    if needs_mask:
        # Zero out the zero-padded tail (trace-time branch; only emitted if padded).
        i = pl.program_id(0)
        row = jax.lax.broadcasted_iota(jnp.int32, l.shape, 0)
        col = jax.lax.broadcasted_iota(jnp.int32, l.shape, 1)
        flat = (i * block_rows + row) * _LANES + col
        l = jnp.where(flat < total, l, 0.0)

    # Per-lane partial sum for this block (sublane reduce; VPU/XLU have slack
    # in a memory-bound kernel). Final lane reduce happens once, in the wrapper.
    out_ref[0] = jnp.sum(l, axis=0, keepdims=True)


def robust_message_loss(decoded_message: jax.Array,
                        target_message: jax.Array,
                        loss_type: str = "bce_logits",
                        pos_weight=None,
                        block_rows: int = 2048) -> jax.Array:
    """Mean BCE(-with-logits) loss over all elements of the message tensors."""
    if decoded_message.shape != target_message.shape:
        raise ValueError("decoded_message and target_message must have the same shape")
    if loss_type not in ("bce", "bce_logits"):
        raise ValueError(f"unsupported loss_type: {loss_type}")

    total = int(decoded_message.size)
    rows = max(_SUBLANES, _round_up(pl.cdiv(total, _LANES), _SUBLANES))
    block_rows = max(_SUBLANES, _round_up(min(block_rows, rows), _SUBLANES))
    num_blocks = pl.cdiv(rows, block_rows)
    padded_rows = num_blocks * block_rows
    padded_total = padded_rows * _LANES
    needs_mask = padded_total != total

    def to_tiles(a):
        flat = a.reshape(-1)
        if padded_total != total:
            flat = jnp.pad(flat, (0, padded_total - total))
        return flat.reshape(padded_rows, _LANES)

    x2d = to_tiles(decoded_message)
    y2d = to_tiles(target_message)

    kernel = functools.partial(
        _bce_partial_kernel,
        loss_type=loss_type,
        pos_weight=None if pos_weight is None else float(pos_weight),
        total=total,
        block_rows=block_rows,
        needs_mask=needs_mask,
    )

    # NOTE: for tiny messages (a few KiB) a plain jnp expression would be faster than
    # any custom call; the Pallas path is kept unconditionally so the kernel is exercised.
    partials = pl.pallas_call(
        kernel,
        out_shape=jax.ShapeDtypeStruct((num_blocks, 1, _LANES), jnp.float32),
        grid=(num_blocks,),
        in_specs=[
            pl.BlockSpec((block_rows, _LANES), lambda i: (i, 0)),
            pl.BlockSpec((block_rows, _LANES), lambda i: (i, 0)),
        ],
        out_specs=pl.BlockSpec((1, 1, _LANES), lambda i: (i, 0, 0)),
        compiler_params=pltpu.CompilerParams(
            dimension_semantics=("parallel",)),
    )(x2d, y2d)

    return jnp.sum(partials) * jnp.float32(1.0 / total)


# ----------------------------- pure-JAX references -----------------------------

def _ref_bce_logits(x, y, pos_weight=None):
    x = x.astype(jnp.float32)
    y = y.astype(jnp.float32)
    sp_neg = jnp.log1p(jnp.exp(-jnp.abs(x))) + jnp.maximum(-x, 0.0)
    coef = 1.0 if pos_weight is None else 1.0 + (float(pos_weight) - 1.0) * y
    return jnp.mean((1.0 - y) * x + coef * sp_neg)


def _ref_bce(x, y):
    x = x.astype(jnp.float32)
    y = y.astype(jnp.float32)
    return jnp.mean(-(y * jnp.maximum(jnp.log(x), -100.0)
                      + (1.0 - y) * jnp.maximum(jnp.log(1.0 - x), -100.0)))


if __name__ == "__main__":
    key = jax.random.PRNGKey(0)
    k1, k2, k3 = jax.random.split(key, 3)

    # Small message batch consistent with the module: 8 packets of 256 bits.
    B, L = 8, 256
    decoded_logits = jax.random.normal(k1, (B, L), dtype=jnp.float32) * 2.0
    target_bits = (jax.random.uniform(k2, (B, L)) > 0.5).astype(jnp.float32)

    # default constructor: loss_type='bce_logits', pos_weight=None
    loss = jax.block_until_ready(
        robust_message_loss(decoded_logits, target_bits))
    ref = _ref_bce_logits(decoded_logits, target_bits)
    assert jnp.allclose(loss, ref, rtol=1e-5, atol=1e-5), (loss, ref)

    # pos_weight path
    loss_pw = jax.block_until_ready(
        robust_message_loss(decoded_logits, target_bits, pos_weight=2.0))
    ref_pw = _ref_bce_logits(decoded_logits, target_bits, pos_weight=2.0)
    assert jnp.allclose(loss_pw, ref_pw, rtol=1e-5, atol=1e-5), (loss_pw, ref_pw)

    # 'bce' path on probabilities
    probs = jax.nn.sigmoid(decoded_logits)
    loss_bce = jax.block_until_ready(
        robust_message_loss(probs, target_bits, loss_type="bce"))
    ref_bce = _ref_bce(probs, target_bits)
    assert jnp.allclose(loss_bce, ref_bce, rtol=1e-5, atol=1e-5), (loss_bce, ref_bce)

    # Larger, non-multiple-of-128, bf16 inputs: exercises the multi-block grid,
    # the in-kernel padding mask, and the reduced-HBM-traffic dtype path.
    B2, L2 = 48, 1000
    logits2 = (jax.random.normal(k3, (B2, L2), dtype=jnp.float32) * 2.0
               ).astype(jnp.bfloat16)
    targets2 = (jax.random.uniform(k2, (B2, L2)) > 0.5).astype(jnp.bfloat16)
    loss2 = jax.block_until_ready(
        robust_message_loss(logits2, targets2, block_rows=64))
    ref2 = _ref_bce_logits(logits2, targets2)
    assert jnp.allclose(loss2, ref2, rtol=1e-4, atol=1e-4), (loss2, ref2)

    print("KERNEL_OK")
</pallas_src>

<mosaic_0001>
module attributes {stable_mosaic.version = 11 : i64} {
  func.func @_bce_partial_kernel(%arg0: i32, %arg1: memref<16x128xf32, #tpu.memory_space<vmem>>, %arg2: memref<16x128xf32, #tpu.memory_space<vmem>>, %arg3: memref<1x1x128xf32, #tpu.memory_space<vmem>>) attributes {dimension_semantics = [#tpu.dimension_semantics<parallel>], iteration_bounds = array<i64: 1>, scalar_prefetch = 0 : i64, scratch_operands = 0 : i64, tpu.core_type = #tpu.core_type<tc>, window_params = [{transform_indices = @transform_0, window_bounds = array<i64: 16, 128>}, {transform_indices = @transform_1, window_bounds = array<i64: 16, 128>}, {transform_indices = @transform_2, window_bounds = array<i64: 1, 1, 128>}]} {
    %c0 = arith.constant 0 : index
    %c0_0 = arith.constant 0 : index
    %0 = vector.load %arg1[%c0, %c0_0] : memref<16x128xf32, #tpu.memory_space<vmem>>, vector<16x128xf32>
    %c0_1 = arith.constant 0 : index
    %c0_2 = arith.constant 0 : index
    %1 = vector.load %arg2[%c0_1, %c0_2] : memref<16x128xf32, #tpu.memory_space<vmem>>, vector<16x128xf32>
    %2 = math.absf %0 : vector<16x128xf32>
    %cst = arith.constant 0.000000e+00 : f32
    %3 = vector.broadcast %cst : f32 to vector<16x128xf32>
    %4 = arith.subf %3, %2 : vector<16x128xf32>
    %5 = math.exp %4 : vector<16x128xf32>
    %6 = math.log1p %5 : vector<16x128xf32>
    %cst_3 = arith.constant 0.000000e+00 : f32
    %7 = vector.broadcast %cst_3 : f32 to vector<16x128xf32>
    %8 = arith.subf %7, %0 : vector<16x128xf32>
    %cst_4 = arith.constant 0.000000e+00 : f32
    %9 = vector.broadcast %cst_4 : f32 to vector<16x128xf32>
    %10 = arith.maximumf %8, %9 : vector<16x128xf32>
    %11 = arith.addf %6, %10 : vector<16x128xf32>
    %cst_5 = arith.constant 1.000000e+00 : f32
    %12 = vector.broadcast %cst_5 : f32 to vector<16x128xf32>
    %13 = arith.subf %12, %1 : vector<16x128xf32>
    %14 = arith.mulf %13, %0 : vector<16x128xf32>
    %cst_6 = arith.constant 1.000000e+00 : f32
    %15 = vector.broadcast %cst_6 : f32 to vector<16x128xf32>
    %16 = arith.mulf %15, %11 : vector<16x128xf32>
    %17 = arith.addf %14, %16 : vector<16x128xf32>
    %cst_7 = arith.constant dense<0.000000e+00> : vector<128xf32>
    %18 = vector.multi_reduction <add>, %17, %cst_7 [0] : vector<16x128xf32> to vector<128xf32>
    %19 = vector.shape_cast %18 : vector<128xf32> to vector<1x128xf32>
    %c0_8 = arith.constant 0 : index
    %c0_9 = arith.constant 0 : index
    %c0_10 = arith.constant 0 : index
    %20 = vector.load %arg3[%c0_8, %c0_9, %c0_10] : memref<1x1x128xf32, #tpu.memory_space<vmem>>, vector<1x1x128xf32>
    %21 = vector.shape_cast %20 : vector<1x1x128xf32> to vector<1x128xf32>
    %22 = vector.shape_cast %19 : vector<1x128xf32> to vector<1x1x128xf32>
    tpu.vector_store %arg3[%c0_8, %c0_9, %c0_10], %22 {strides = array<i32>} : memref<1x1x128xf32, #tpu.memory_space<vmem>>, vector<1x1x128xf32>,
    return
  }
  func.func @transform_0(%arg0: i32) -> (i32, i32) {
    %c0_i32 = arith.constant 0 : i32
    %c0_i32_0 = arith.constant 0 : i32
    return %arg0, %c0_i32 : i32, i32
  }
  func.func @transform_1(%arg0: i32) -> (i32, i32) {
    %c0_i32 = arith.constant 0 : i32
    %c0_i32_0 = arith.constant 0 : i32
    return %arg0, %c0_i32 : i32, i32
  }
  func.func @transform_2(%arg0: i32) -> (i32, i32, i32) {
    %c0_i32 = arith.constant 0 : i32
    %c0_i32_0 = arith.constant 0 : i32
    %c0_i32_1 = arith.constant 0 : i32
    return %arg0, %c0_i32, %c0_i32_0 : i32, i32, i32
  }
}

</mosaic_0001>

<bundles_post_ra>
// kernel: tpu_custom_call.1
= control target key start
LH: loop header
LB: loop body
LE: loop exit
PB: predicated region body
PF: predicated region fallthrough
CT: control target
= control target key end

     0   :  { %7 = vsyncpa [#allocation3], 0  ;;  %s247_s0 = inlined_call_operand.hbm [shape: f32[16,128], index: 0, kind: input, shape index: {}]   ;;  %s248_s1 = inlined_call_operand.hbm [shape: f32[16,128], index: 1, kind: input, shape index: {}]   ;;  %s249_s2 = inlined_call_operand.hbm [shape: f32[1,1,128], index: 2, kind: output, shape index: {}]  }
   0x1   :  { %8 = vsyncpa [#allocation6], 0 }
   0x2   :  { %9 = vsyncpa [#allocation4], 0  ;;  %s191_s9 = smov [#allocation2]   ;;  %s119_s13 = scalar_lea.hbm %s247_s0, 256 }
   0x3   :  { %s15_s10 = sshll.u32 %s191_s9, 4  ;;  %p120_p0 = scmp.ne.s32.totalorder %s247_s0, %s119_s13  ;;  %s16_s10 = int_to_ptr.vmem [resolvable:$true] %s15_s10 }
   0x4   :  { %p123_p1 = scmp.lt.u32.totalorder %s119_s13, %s247_s0 }
   0x6   :  { %p125_p2 = pnand %p123_p1, %p120_p0 }
   0x8   :  { %128 = shalt.err (!%p125_p2)
}
   0x9   :  { %s129_s18 = scalar_lea.vmem %s16_s10, 256  ;;  %p134_p4 = scmp.lt.s32.totalorder %s16_s10, %s16_s10 }
   0xa   :  { %p130_p3 = scmp.ne.s32.totalorder %s16_s10, %s129_s18  ;;  %p135_p5 = scmp.lt.s32.totalorder %s129_s18, %s129_s18 }
   0xc   :  { %p136_p6 = por %p135_p5, %p134_p4 }
   0xe   :  { %p137_p7 = pnand %p136_p6, %p130_p3 }
  0x10   :  { %140 = shalt.err (!%p137_p7)
}
  0x11   :  { %s192_s19 = smov 128   ;;  %s193_s20 = smov 8  }
  0x12   :  { %21 = dma.hbm_to_vmem [thread:$0]  %s247_s0, 256, %s16_s10, [#allocation3], %s192_s19, %s192_s19, %s193_s20  }
  0x13   :  { %s194_s23 = smov [#allocation5]   ;;  %s141_s27 = scalar_lea.hbm %s248_s1, 256 }
  0x14   :  { %s27_s24 = sshll.u32 %s194_s23, 4  ;;  %p142_p8 = scmp.ne.s32.totalorder %s248_s1, %s141_s27  ;;  %s28_s24 = int_to_ptr.vmem [resolvable:$true] %s27_s24 }
  0x15   :  { %p145_p9 = scmp.lt.u32.totalorder %s141_s27, %s248_s1 }
  0x17   :  { %p147_p10 = pnand %p145_p9, %p142_p8 }
  0x19   :  { %150 = shalt.err (!%p147_p10)
}
  0x1a   :  { %s151_s4 = scalar_lea.vmem %s28_s24, 256  ;;  %p156_p12 = scmp.lt.s32.totalorder %s28_s24, %s28_s24 }
  0x1b   :  { %p152_p11 = scmp.ne.s32.totalorder %s28_s24, %s151_s4  ;;  %p157_p13 = scmp.lt.s32.totalorder %s151_s4, %s151_s4 }
  0x1d   :  { %p158_p0 = por %p157_p13, %p156_p12 }
  0x1f   :  { %p159_p1 = pnand %p158_p0, %p152_p11 }
  0x21   :  { %162 = shalt.err (!%p159_p1)
}
  0x22   :  { %33 = dma.hbm_to_vmem [thread:$0]  %s248_s1, 256, %s28_s24, [#allocation6], %s192_s19, %s192_s19, %s193_s20  }
  0x23   :  { %185 = dma.done.wait [#allocation3], 256  }
  0x24   :  { %186 = vsyncadd [#allocation3], 4294967040 }
  0x25   :  { %187 = dma.done.wait [#allocation6], 256  }
  0x26   :  { %188 = vsyncadd [#allocation6], 4294967040  ;;  %v40_v0 = vld [vmem:[#allocation2] sm:$0xff]  ;;  %v41_v1 = vld [vmem:[#allocation2 + $0x8] sm:$0xff]  ;;  %s195_s1 = smov [#allocation7]  }
  0x27   :  { %v44_v2 = vand.u32 2147483647, %v40_v0  ;;  %v45_v3 = vand.u32 2147483647, %v41_v1  ;;  %v42_v14 = vld [vmem:[#allocation5] sm:$0xff]  ;;  %v43_v16 = vld [vmem:[#allocation5 + $0x8] sm:$0xff] }
  0x28   :  { %v70_v19 = vsub.f32 0.0, %v40_v0  ;;  %v71_v21 = vsub.f32 0.0, %v41_v1  ;;  %v76_v22 = vsub.f32 1.0, %v42_v14  ;;  %v77_v24 = vsub.f32 1.0, %v43_v16  ;;  %s96_s6 = sshll.u32 %s195_s1, 4  ;;  %s97_s6 = int_to_ptr.vmem [resolvable:$true] %s96_s6 }
  0x29   :  { %v46_v4 = vsub.f32 0.0, %v44_v2  ;;  %v47_v5 = vsub.f32 0.0, %v45_v3  ;;  %s163_s7 = scalar_lea.vmem %s97_s6, 16  ;;  %s167_s8 = scalar_lea.vmem %s97_s6, 32 }
  0x2a   :  { %v72_v27 = vmax.f32 %v70_v19, 0.0  ;;  %v73_v30 = vmax.f32 %v71_v21, 0.0  ;;  %v78_v32 = vmul.f32 %v76_v22, %v40_v0  ;;  %v79_v34 = vmul.f32 %v77_v24, %v41_v1  ;;  %p164_p2 = scmp.ne.s32.totalorder %s97_s6, %s163_s7  ;;  %p168_p3 = scmp.lt.s32.totalorder %s97_s6, %s97_s6 }
  0x2b   :  { %v48_v6 = vmul.f32 1.442695, %v46_v4  ;;  %v50_v7 = vmul.f32 1.442695, %v47_v5  ;;  %p169_p4 = scmp.lt.s32.totalorder %s167_s8, %s163_s7 }
  0x2d   :  { %111 = vpow2.f32 %v48_v6  ;;  %p170_p5 = por %p169_p4, %p168_p3 }
  0x2e   :  { %113 = vpow2.f32 %v50_v7 }
  0x2f   :  { %p171_p6 = pnand %p170_p5, %p164_p2 }
  0x37   :  { %v112_v8 = vpop.eup %111 }
  0x38   :  { %v114_v9 = vpop.eup %113  ;;  %v52_v10 = vadd.f32 1.0, %v112_v8  ;;  %v55_v12 = vmul.f32 -0.5, %v112_v8  ;;  %v58_v17 = vand.u32 2147483647, %v112_v8 }
  0x39   :  { %v61_v11 = vadd.f32 1.0, %v114_v9  ;;  %v64_v13 = vmul.f32 -0.5, %v114_v9  ;;  %v67_v20 = vand.u32 2147483647, %v114_v9 }
  0x3a   :  { %115 = vlog2.f32 %v52_v10  ;;  %v56_v15 = vadd.f32 1.0, %v55_v12  ;;  %vm59_vm0 = vcmp.lt.f32.partialorder %v58_v17, 0.0004427343 }
  0x3b   :  { %117 = vlog2.f32 %v61_v11  ;;  %v65_v18 = vadd.f32 1.0, %v64_v13  ;;  %vm68_vm1 = vcmp.lt.f32.partialorder %v67_v20, 0.0004427343 }
  0x3c   :  { %v57_v23 = vmul.f32 %v112_v8, %v56_v15 }
  0x3d   :  { %v66_v26 = vmul.f32 %v114_v9, %v65_v18 }
  0x44   :  { %v116_v25 = vpop.eup %115 }
  0x45   :  { %v118_v28 = vpop.eup %117  ;;  %v54_v29 = vmul.f32 0.6931472, %v116_v25 }
  0x46   :  { %v63_v31 = vmul.f32 0.6931472, %v118_v28 }
  0x47   :  { %v60_v33 = vsel %vm59_vm0, %v57_v23, %v54_v29 }
  0x48   :  { %v69_v35 = vsel %vm68_vm1, %v66_v26, %v63_v31  ;;  %v74_v36 = vadd.f32 %v72_v27, %v60_v33 }
  0x49   :  { %v75_v37 = vadd.f32 %v73_v30, %v69_v35 }
  0x4a   :  { %v80_v38 = vadd.f32 %v78_v32, %v74_v36 }
  0x4b   :  { %v81_v39 = vadd.f32 %v79_v34, %v75_v37 }
  0x4d   :  { %v82_v40 = vadd.f32 %v81_v39, %v80_v38 }
  0x4f   :  { %v83_v41 = vrot.slane %v82_v40, 4 }
  0x51   :  { %v84_v42 = vadd.f32 %v83_v41, %v82_v40 }
  0x53   :  { %v85_v43 = vrot.slane %v84_v42, 2 }
  0x55   :  { %v86_v44 = vadd.f32 %v85_v43, %v84_v42 }
  0x57   :  { %v87_v45 = vrot.slane %v86_v44, 1 }
  0x59   :  { %v88_v46 = vadd.f32 %v87_v45, %v86_v44 }
  0x5b   :  { %89 = vst [vmem:[#allocation7] sm:$0x1] %v88_v46 }
  0x5c   :  { %174 = shalt.err (!%p171_p6)
}
  0x5d   :  { %s175_s11 = scalar_lea.hbm %s249_s2, 16 }
  0x5e   :  { %p176_p7 = scmp.ne.s32.totalorder %s249_s2, %s175_s11  ;;  %p179_p8 = scmp.lt.u32.totalorder %s175_s11, %s249_s2 }
  0x60   :  { %p181_p9 = pnand %p179_p8, %p176_p7 }
  0x62   :  { %184 = shalt.err (!%p181_p9)
}
  0x63   :  { %99 = dma.vmem_to_hbm [thread:$0]  %s97_s6, 16, %s249_s2, [#allocation4]  }
  0x64   :  { %189 = dma.done.wait [#allocation4], 16  }
  0x65   :  { %190 = vsyncadd [#allocation4], 4294967280 }
  0x66   :  { %103 = vsyncpa [#allocation3], 1 }
  0x67   :  { %104 = vsyncpa [#allocation6], 1 }
  0x68   :  { %105 = vsyncpa [#allocation4], 1 }

</bundles_post_ra>
